<compile_context>
chip_gen: v6e
topology: v6e:2x2x1
jax: 0.10.0
libtpu: 0.0.40
codegen_flags: <defaults>
</compile_context>

<pallas_src>
import functools

import numpy as np
import jax
import jax.numpy as jnp
from jax import lax
from jax.experimental import pallas as pl
from jax.experimental.pallas import tpu as pltpu

EPS = 1e-5


def bn_fold(gamma, beta, mean, var):
    scale = gamma / jnp.sqrt(var + EPS)
    bias = beta - mean * scale
    return scale.astype(jnp.float32), bias.astype(jnp.float32)


def _round_up(x, m):
    return ((x + m - 1) // m) * m


def _border_mask(H, W, c1p):
    """(9*c1p, H*W) 0/1 f32 mask implementing the pad=1 halo for the 9 taps
    ((dy,dx) in (-1,0,1) x (-1,0,1), dy-major), broadcast over c1p channel rows."""
    row = np.repeat(np.arange(H), W)
    col = np.tile(np.arange(W), H)
    blocks = []
    for dy in (-1, 0, 1):
        for dx in (-1, 0, 1):
            ok = ((row + dy >= 0) & (row + dy < H) &
                  (col + dx >= 0) & (col + dx < W)).astype(np.float32)
            blocks.append(np.broadcast_to(ok, (c1p, H * W)))
    return jnp.asarray(np.concatenate(blocks, axis=0))


def _pick_b_tile(N):
    """Largest divisor of N that keeps grid length >= 2 (v7x: both TCs busy)
    while amortizing per-grid-step overhead; capped to keep VMEM modest."""
    if N < 2:
        return 1
    cap = max(1, min(N // 2, 8))
    for bt in range(cap, 0, -1):
        if N % bt == 0:
            return bt
    return 1


# --------------------------- fused bottleneck kernel -------------------------
def _bottleneck_kernel(x_ref, w1_ref, b1_ref, w2_ref, b2_ref, w3_ref, b3_ref,
                       mask_ref, o_ref, *, W, b_tile):
    """b_tile batch elements per grid step.  Activations are (C, H*W):
    channels on sublanes, flattened spatial on the lane axis (lane-dense)."""
    HW = mask_ref.shape[-1]
    w1 = w1_ref[...]              # (C1p, C0)     bf16, BN scale folded in
    w2 = w2_ref[...]              # (C2p, 9*C1p)  bf16, BN scale folded in
    w3 = w3_ref[...]              # (C3,  C2p)    bf16, BN scale folded in
    b1 = b1_ref[...]              # (C1p, 1) f32
    b2 = b2_ref[...]              # (C2p, 1) f32
    b3 = b3_ref[...]              # (C3,  1) f32
    mask = mask_ref[...]          # (9*C1p, HW) f32 precomputed halo mask

    for b in range(b_tile):       # static unroll; batch elements independent
        x = x_ref[b]              # (C0, HW) bf16

        # ---- conv1 (1x1) + bn1 + relu ------------------------------------
        o1 = jnp.dot(w1, x, preferred_element_type=jnp.float32)     # (C1p, HW)
        o1 = jnp.maximum(o1 + b1, 0.0)

        # ---- conv2 (3x3, pad=1, stride=1) as ONE K=9*C1p matmul ----------
        # Shifted views via XLU lane rotation of the flattened spatial axis;
        # border taps zeroed with the precomputed mask (== zero padding).
        # Each piece is a whole sublane tile (C1p % 8 == 0) -> concat is layout.
        pieces = []
        for dy in (-1, 0, 1):
            for dx in (-1, 0, 1):
                s = dy * W + dx
                if s == 0:
                    pieces.append(o1)
                else:
                    pieces.append(pltpu.roll(o1, shift=(-s) % HW, axis=1))
        patches = (jnp.concatenate(pieces, axis=0) * mask).astype(jnp.bfloat16)
        o2 = jnp.dot(w2, patches, preferred_element_type=jnp.float32)  # (C2p, HW)
        o2 = jnp.maximum(o2 + b2, 0.0)

        # ---- conv3 (1x1) + bn3 + residual + relu -------------------------
        o3 = jnp.dot(w3, o2.astype(jnp.bfloat16),
                     preferred_element_type=jnp.float32)               # (C3, HW)
        # Residual re-read late (short live range), bf16 -> f32 upcast.
        o3 = o3 + b3 + x_ref[b].astype(jnp.float32)
        o_ref[b] = jnp.maximum(o3, 0.0).astype(o_ref.dtype)


def fused_bottleneck(x, w1, b1, w2, b2, w3, b3, mask, *, W, b_tile):
    N, C0, HW = x.shape
    C1p = w1.shape[0]
    C2p = w2.shape[0]
    C3 = w3.shape[0]
    assert w2.shape[1] == 9 * C1p and mask.shape == (9 * C1p, HW)
    assert N % b_tile == 0
    kernel = functools.partial(_bottleneck_kernel, W=W, b_tile=b_tile)
    full = lambda n: (0, 0)
    return pl.pallas_call(
        kernel,
        out_shape=jax.ShapeDtypeStruct((N, C3, HW), jnp.bfloat16),
        grid=(N // b_tile,),
        in_specs=[
            pl.BlockSpec((b_tile, C0, HW), lambda n: (n, 0, 0)),  # x (bf16, residual)
            pl.BlockSpec((C1p, C0), full),                        # w1 (scale-folded)
            pl.BlockSpec((C1p, 1), full),                         # bn1 bias
            pl.BlockSpec((C2p, 9 * C1p), full),                   # w2 (scale-folded)
            pl.BlockSpec((C2p, 1), full),                         # bn2 bias
            pl.BlockSpec((C3, C2p), full),                        # w3 (scale-folded)
            pl.BlockSpec((C3, 1), full),                          # bn3 bias
            pl.BlockSpec((9 * C1p, HW), full),                    # halo mask
        ],
        out_specs=pl.BlockSpec((b_tile, C3, HW), lambda n: (n, 0, 0)),
        compiler_params=pltpu.CompilerParams(
            dimension_semantics=("parallel",),
            vmem_limit_bytes=32 * 1024 * 1024),
    )(x, w1, b1, w2, b2, w3, b3, mask)


# ------------------------------- module wrapper ------------------------------
class CompactBottleneckPallas:
    expansion = 4

    def __init__(self, in_planes, planes, cprate, cur_convid, stride=1,
                 downsample=None, key=None):
        assert stride == 1, "only stride=1 is exercised here"
        assert downsample is None
        # channel widths exactly as in the PyTorch module
        last_cout = int(in_planes * (1 - cprate[cur_convid - 1]))
        c1 = int(planes * (1 - cprate[cur_convid]))
        c2 = int(planes * (1 - cprate[cur_convid + 1]))
        c3 = int(self.expansion * planes * (1 - cprate[cur_convid + 2]))
        assert c3 == in_planes == last_cout, \
            "with downsample=None the residual add requires matching channels"
        self.dims = (last_cout, c1, c2, c3)
        c0 = last_cout
        c1p = _round_up(c1, 8)      # sublane-align the pruned intermediate widths
        c2p = _round_up(c2, 8)
        self.padded = (c1p, c2p)

        keys = jax.random.split(key, 15)

        def bn_params(kg, kb, km, kv, c):
            gamma = 1.0 + 0.1 * jax.random.normal(kg, (c,), jnp.float32)
            beta = 0.1 * jax.random.normal(kb, (c,), jnp.float32)
            mean = 0.1 * jax.random.normal(km, (c,), jnp.float32)
            var = 0.5 + 0.1 * jnp.abs(jax.random.normal(kv, (c,), jnp.float32))
            return gamma, beta, mean, var

        # conv weights (synthetic init), natural layouts kept for the reference
        self.w1 = (jax.random.normal(keys[0], (c0, c1), jnp.float32)
                   / np.sqrt(c0))                           # 1x1: (Cin, Cout)
        self.w2 = (jax.random.normal(keys[1], (3, 3, c1, c2), jnp.float32)
                   / np.sqrt(9 * c1))                       # 3x3: HWIO
        self.w3 = (jax.random.normal(keys[2], (c2, c3), jnp.float32)
                   / np.sqrt(c2))                           # 1x1: (Cin, Cout)
        self.bn1 = bn_params(*keys[3:7], c1)
        self.bn2 = bn_params(*keys[7:11], c2)
        self.bn3 = bn_params(*keys[11:15], c3)

        # ---- host-side: fold BN scales into f32 weights, pad pruned widths
        # to x8 sublane tiles, then cast to MXU-ready bf16 ----
        s1, bb1 = bn_fold(*self.bn1)
        s2, bb2 = bn_fold(*self.bn2)
        s3, bb3 = bn_fold(*self.bn3)

        w1f = (self.w1 * s1[None, :]).T                              # (c1, c0) f32
        self.w1p = jnp.pad(w1f, ((0, c1p - c1), (0, 0))).astype(jnp.bfloat16)
        self.b1p = jnp.pad(bb1, (0, c1p - c1)).reshape(c1p, 1)

        w2f = jnp.transpose(self.w2 * s2[None, None, None, :], (3, 0, 1, 2))  # (c2,3,3,c1)
        w2f = jnp.pad(w2f, ((0, 0), (0, 0), (0, 0), (0, c1p - c1)))           # (c2,3,3,c1p)
        w2f = w2f.reshape(c2, 9 * c1p)
        self.w2p = jnp.pad(w2f, ((0, c2p - c2), (0, 0))).astype(jnp.bfloat16)  # (c2p, 9*c1p)
        self.b2p = jnp.pad(bb2, (0, c2p - c2)).reshape(c2p, 1)

        w3f = (self.w3 * s3[None, :]).T                              # (c3, c2) f32
        self.w3p = jnp.pad(w3f, ((0, 0), (0, c2p - c2))).astype(jnp.bfloat16)  # (c3, c2p)
        self.b3p = bb3.reshape(c3, 1)

    def __call__(self, x_nchw):
        N, C0, H, W = x_nchw.shape
        c0, c1, c2, c3 = self.dims
        c1p, _ = self.padded
        assert C0 == c0
        b_tile = _pick_b_tile(N)
        mask = _border_mask(H, W, c1p)
        # NCHW kept: only a free trailing-dim reshape; bf16 at the HBM boundary.
        x = x_nchw.reshape(N, C0, H * W).astype(jnp.bfloat16)
        out = fused_bottleneck(x, self.w1p, self.b1p, self.w2p, self.b2p,
                               self.w3p, self.b3p, mask, W=W, b_tile=b_tile)
        return out.reshape(N, c3, H, W)                     # NCHW, bf16

    # pure-JAX reference (correctness check only; mirrors the kernel's bf16
    # boundary, bf16 MXU casts and host-side BN-scale folding)
    def reference(self, x_nchw):
        c0, c1, c2, c3 = self.dims
        s1, bb1 = bn_fold(*self.bn1)
        s2, bb2 = bn_fold(*self.bn2)
        s3, bb3 = bn_fold(*self.bn3)
        xb = x_nchw.astype(jnp.bfloat16)
        x = jnp.transpose(xb, (0, 2, 3, 1))                  # NHWC bf16

        def conv(a, w, padding):
            return lax.conv_general_dilated(
                a.astype(jnp.bfloat16), w.astype(jnp.bfloat16), (1, 1), padding,
                dimension_numbers=("NHWC", "HWIO", "NHWC"),
                preferred_element_type=jnp.float32)

        o = jnp.maximum(
            conv(x, (self.w1 * s1[None, :]).reshape(1, 1, c0, c1), "VALID") + bb1, 0.0)
        o = jnp.maximum(
            conv(o, self.w2 * s2[None, None, None, :], ((1, 1), (1, 1))) + bb2, 0.0)
        o = conv(o, (self.w3 * s3[None, :]).reshape(1, 1, c2, c3), "VALID") + bb3
        o = jnp.maximum(o + x.astype(jnp.float32), 0.0).astype(jnp.bfloat16)
        return jnp.transpose(o, (0, 3, 1, 2))                # NCHW bf16


if __name__ == "__main__":
    root = jax.random.PRNGKey(0)
    k_params, k_x = jax.random.split(root)

    # in_planes=32, planes=8, expansion=4 -> pruned widths 32 -> 4 -> 4 -> 32
    in_planes, planes = 32, 8
    cprate = [0.0, 0.5, 0.5, 0.0]
    block = CompactBottleneckPallas(in_planes, planes, cprate, cur_convid=1,
                                    stride=1, downsample=None, key=k_params)

    N, H, W = 2, 16, 16                       # H*W = 256 -> lane-dense
    x = jax.random.normal(k_x, (N, in_planes, H, W), jnp.float32)   # NCHW

    fwd = jax.jit(block.__call__)
    out = jax.block_until_ready(fwd(x))

    ref = jax.block_until_ready(block.reference(x))
    np.testing.assert_allclose(np.asarray(out).astype(np.float32),
                               np.asarray(ref).astype(np.float32),
                               rtol=1e-2, atol=1e-2)
    assert out.shape == (N, in_planes, H, W)
    assert out.dtype == jnp.bfloat16
    print("KERNEL_OK")
</pallas_src>

<mosaic_0001>
module attributes {stable_mosaic.version = 11 : i64} {
  func.func @_bottleneck_kernel(%arg0: i32, %arg1: memref<1x32x256xbf16, #tpu.memory_space<vmem>>, %arg2: memref<8x32xbf16, #tpu.memory_space<vmem>>, %arg3: memref<8x1xf32, #tpu.memory_space<vmem>>, %arg4: memref<8x72xbf16, #tpu.memory_space<vmem>>, %arg5: memref<8x1xf32, #tpu.memory_space<vmem>>, %arg6: memref<32x8xbf16, #tpu.memory_space<vmem>>, %arg7: memref<32x1xf32, #tpu.memory_space<vmem>>, %arg8: memref<72x256xf32, #tpu.memory_space<vmem>>, %arg9: memref<1x32x256xbf16, #tpu.memory_space<vmem>>) attributes {dimension_semantics = [#tpu.dimension_semantics<parallel>], iteration_bounds = array<i64: 2>, scalar_prefetch = 0 : i64, scratch_operands = 0 : i64, tpu.core_type = #tpu.core_type<tc>, window_params = [{transform_indices = @transform_0, window_bounds = array<i64: 1, 32, 256>}, {pipeline_mode = #tpu.pipeline_mode<synchronous>, transform_indices = @transform_1, window_bounds = array<i64: 8, 32>}, {pipeline_mode = #tpu.pipeline_mode<synchronous>, transform_indices = @transform_2, window_bounds = array<i64: 8, 1>}, {pipeline_mode = #tpu.pipeline_mode<synchronous>, transform_indices = @transform_3, window_bounds = array<i64: 8, 72>}, {pipeline_mode = #tpu.pipeline_mode<synchronous>, transform_indices = @transform_4, window_bounds = array<i64: 8, 1>}, {pipeline_mode = #tpu.pipeline_mode<synchronous>, transform_indices = @transform_5, window_bounds = array<i64: 32, 8>}, {pipeline_mode = #tpu.pipeline_mode<synchronous>, transform_indices = @transform_6, window_bounds = array<i64: 32, 1>}, {pipeline_mode = #tpu.pipeline_mode<synchronous>, transform_indices = @transform_7, window_bounds = array<i64: 72, 256>}, {transform_indices = @transform_8, window_bounds = array<i64: 1, 32, 256>}]} {
    %c0 = arith.constant 0 : index
    %c0_0 = arith.constant 0 : index
    %0 = vector.load %arg2[%c0, %c0_0] : memref<8x32xbf16, #tpu.memory_space<vmem>>, vector<8x32xbf16>
    %c0_1 = arith.constant 0 : index
    %c0_2 = arith.constant 0 : index
    %1 = vector.load %arg4[%c0_1, %c0_2] : memref<8x72xbf16, #tpu.memory_space<vmem>>, vector<8x72xbf16>
    %c0_3 = arith.constant 0 : index
    %c0_4 = arith.constant 0 : index
    %2 = vector.load %arg6[%c0_3, %c0_4] : memref<32x8xbf16, #tpu.memory_space<vmem>>, vector<32x8xbf16>
    %c0_5 = arith.constant 0 : index
    %c0_6 = arith.constant 0 : index
    %3 = vector.load %arg3[%c0_5, %c0_6] : memref<8x1xf32, #tpu.memory_space<vmem>>, vector<8x1xf32>
    %c0_7 = arith.constant 0 : index
    %c0_8 = arith.constant 0 : index
    %4 = vector.load %arg5[%c0_7, %c0_8] : memref<8x1xf32, #tpu.memory_space<vmem>>, vector<8x1xf32>
    %c0_9 = arith.constant 0 : index
    %c0_10 = arith.constant 0 : index
    %5 = vector.load %arg7[%c0_9, %c0_10] : memref<32x1xf32, #tpu.memory_space<vmem>>, vector<32x1xf32>
    %c0_11 = arith.constant 0 : index
    %c0_12 = arith.constant 0 : index
    %6 = vector.load %arg8[%c0_11, %c0_12] : memref<72x256xf32, #tpu.memory_space<vmem>>, vector<72x256xf32>
    %c0_13 = arith.constant 0 : index
    %c0_14 = arith.constant 0 : index
    %c0_15 = arith.constant 0 : index
    %7 = vector.load %arg1[%c0_13, %c0_14, %c0_15] : memref<1x32x256xbf16, #tpu.memory_space<vmem>>, vector<1x32x256xbf16>
    %8 = vector.shape_cast %7 : vector<1x32x256xbf16> to vector<32x256xbf16>
    %cst = arith.constant dense<0.000000e+00> : vector<8x256xf32>
    %9 = tpu.matmul %0, %8, %cst {dimension_numbers = #tpu.dot_dimension_numbers<[1], [0], [0], [1], [0, 0, 1, 1], [], []>} : vector<8x32xbf16>, vector<32x256xbf16>, vector<8x256xf32> -> vector<8x256xf32>
    %10 = vector.broadcast %3 : vector<8x1xf32> to vector<8x256xf32>
    %11 = arith.addf %9, %10 : vector<8x256xf32>
    %cst_16 = arith.constant 0.000000e+00 : f32
    %12 = vector.broadcast %cst_16 : f32 to vector<8x256xf32>
    %13 = arith.maximumf %11, %12 : vector<8x256xf32>
    %c17_i32 = arith.constant 17 : i32
    %14 = tpu.dynamic_rotate %13 by %c17_i32 dim 1 : vector<8x256xf32>, i32 -> vector<8x256xf32>
    %c16_i32 = arith.constant 16 : i32
    %15 = tpu.dynamic_rotate %13 by %c16_i32 dim 1 : vector<8x256xf32>, i32 -> vector<8x256xf32>
    %c15_i32 = arith.constant 15 : i32
    %16 = tpu.dynamic_rotate %13 by %c15_i32 dim 1 : vector<8x256xf32>, i32 -> vector<8x256xf32>
    %c1_i32 = arith.constant 1 : i32
    %17 = tpu.dynamic_rotate %13 by %c1_i32 dim 1 : vector<8x256xf32>, i32 -> vector<8x256xf32>
    %c255_i32 = arith.constant 255 : i32
    %18 = tpu.dynamic_rotate %13 by %c255_i32 dim 1 : vector<8x256xf32>, i32 -> vector<8x256xf32>
    %c241_i32 = arith.constant 241 : i32
    %19 = tpu.dynamic_rotate %13 by %c241_i32 dim 1 : vector<8x256xf32>, i32 -> vector<8x256xf32>
    %c240_i32 = arith.constant 240 : i32
    %20 = tpu.dynamic_rotate %13 by %c240_i32 dim 1 : vector<8x256xf32>, i32 -> vector<8x256xf32>
    %c239_i32 = arith.constant 239 : i32
    %21 = tpu.dynamic_rotate %13 by %c239_i32 dim 1 : vector<8x256xf32>, i32 -> vector<8x256xf32>
    %22 = tpu.concatenate %14, %15, %16, %17, %13, %18, %19, %20, %21 in 0 : vector<8x256xf32>, vector<8x256xf32>, vector<8x256xf32>, vector<8x256xf32>, vector<8x256xf32>, vector<8x256xf32>, vector<8x256xf32>, vector<8x256xf32>, vector<8x256xf32> -> vector<72x256xf32>
    %23 = arith.mulf %22, %6 : vector<72x256xf32>
    %24 = arith.truncf %23 : vector<72x256xf32> to vector<72x256xbf16>
    %cst_17 = arith.constant dense<0.000000e+00> : vector<8x256xf32>
    %25 = tpu.matmul %1, %24, %cst_17 {dimension_numbers = #tpu.dot_dimension_numbers<[1], [0], [0], [1], [0, 0, 1, 1], [], []>} : vector<8x72xbf16>, vector<72x256xbf16>, vector<8x256xf32> -> vector<8x256xf32>
    %26 = vector.broadcast %4 : vector<8x1xf32> to vector<8x256xf32>
    %27 = arith.addf %25, %26 : vector<8x256xf32>
    %cst_18 = arith.constant 0.000000e+00 : f32
    %28 = vector.broadcast %cst_18 : f32 to vector<8x256xf32>
    %29 = arith.maximumf %27, %28 : vector<8x256xf32>
    %30 = arith.truncf %29 : vector<8x256xf32> to vector<8x256xbf16>
    %cst_19 = arith.constant dense<0.000000e+00> : vector<32x256xf32>
    %31 = tpu.matmul %2, %30, %cst_19 {dimension_numbers = #tpu.dot_dimension_numbers<[1], [0], [0], [1], [0, 0, 1, 1], [], []>} : vector<32x8xbf16>, vector<8x256xbf16>, vector<32x256xf32> -> vector<32x256xf32>
    %32 = vector.broadcast %5 : vector<32x1xf32> to vector<32x256xf32>
    %33 = arith.addf %31, %32 : vector<32x256xf32>
    %c0_20 = arith.constant 0 : index
    %c0_21 = arith.constant 0 : index
    %c0_22 = arith.constant 0 : index
    %34 = vector.load %arg1[%c0_20, %c0_21, %c0_22] : memref<1x32x256xbf16, #tpu.memory_space<vmem>>, vector<1x32x256xbf16>
    %35 = vector.shape_cast %34 : vector<1x32x256xbf16> to vector<32x256xbf16>
    %36 = arith.extf %35 : vector<32x256xbf16> to vector<32x256xf32>
    %37 = arith.addf %33, %36 : vector<32x256xf32>
    %cst_23 = arith.constant 0.000000e+00 : f32
    %38 = vector.broadcast %cst_23 : f32 to vector<32x256xf32>
    %39 = arith.maximumf %37, %38 : vector<32x256xf32>
    %40 = arith.truncf %39 : vector<32x256xf32> to vector<32x256xbf16>
    %c0_24 = arith.constant 0 : index
    %c0_25 = arith.constant 0 : index
    %c0_26 = arith.constant 0 : index
    %41 = vector.load %arg9[%c0_24, %c0_25, %c0_26] : memref<1x32x256xbf16, #tpu.memory_space<vmem>>, vector<1x32x256xbf16>
    %42 = vector.shape_cast %41 : vector<1x32x256xbf16> to vector<32x256xbf16>
    %43 = vector.shape_cast %40 : vector<32x256xbf16> to vector<1x32x256xbf16>
    tpu.vector_store %arg9[%c0_24, %c0_25, %c0_26], %43 {strides = array<i32>} : memref<1x32x256xbf16, #tpu.memory_space<vmem>>, vector<1x32x256xbf16>,
    return
  }
  func.func @transform_0(%arg0: i32) -> (i32, i32, i32) {
    %c0_i32 = arith.constant 0 : i32
    %c0_i32_0 = arith.constant 0 : i32
    %c0_i32_1 = arith.constant 0 : i32
    return %arg0, %c0_i32, %c0_i32_0 : i32, i32, i32
  }
  func.func @transform_1(%arg0: i32) -> (i32, i32) {
    %c0_i32 = arith.constant 0 : i32
    %c0_i32_0 = arith.constant 0 : i32
    %c0_i32_1 = arith.constant 0 : i32
    return %c0_i32, %c0_i32_0 : i32, i32
  }
  func.func @transform_2(%arg0: i32) -> (i32, i32) {
    %c0_i32 = arith.constant 0 : i32
    %c0_i32_0 = arith.constant 0 : i32
    %c0_i32_1 = arith.constant 0 : i32
    return %c0_i32, %c0_i32_0 : i32, i32
  }
  func.func @transform_3(%arg0: i32) -> (i32, i32) {
    %c0_i32 = arith.constant 0 : i32
    %c0_i32_0 = arith.constant 0 : i32
    %c0_i32_1 = arith.constant 0 : i32
    return %c0_i32, %c0_i32_0 : i32, i32
  }
  func.func @transform_4(%arg0: i32) -> (i32, i32) {
    %c0_i32 = arith.constant 0 : i32
    %c0_i32_0 = arith.constant 0 : i32
    %c0_i32_1 = arith.constant 0 : i32
    return %c0_i32, %c0_i32_0 : i32, i32
  }
  func.func @transform_5(%arg0: i32) -> (i32, i32) {
    %c0_i32 = arith.constant 0 : i32
    %c0_i32_0 = arith.constant 0 : i32
    %c0_i32_1 = arith.constant 0 : i32
    return %c0_i32, %c0_i32_0 : i32, i32
  }
  func.func @transform_6(%arg0: i32) -> (i32, i32) {
    %c0_i32 = arith.constant 0 : i32
    %c0_i32_0 = arith.constant 0 : i32
    %c0_i32_1 = arith.constant 0 : i32
    return %c0_i32, %c0_i32_0 : i32, i32
  }
  func.func @transform_7(%arg0: i32) -> (i32, i32) {
    %c0_i32 = arith.constant 0 : i32
    %c0_i32_0 = arith.constant 0 : i32
    %c0_i32_1 = arith.constant 0 : i32
    return %c0_i32, %c0_i32_0 : i32, i32
  }
  func.func @transform_8(%arg0: i32) -> (i32, i32, i32) {
    %c0_i32 = arith.constant 0 : i32
    %c0_i32_0 = arith.constant 0 : i32
    %c0_i32_1 = arith.constant 0 : i32
    return %arg0, %c0_i32, %c0_i32_0 : i32, i32, i32
  }
}

</mosaic_0001>

<bundles_post_ra>
// kernel: a_call__.1
= control target key start
LH: loop header
LB: loop body
LE: loop exit
PB: predicated region body
PF: predicated region fallthrough
CT: control target
= control target key end

     0   :  { %s883_s27 = smov 0   ;;  %s1083_s0 = inlined_call_operand.vmem [shape: bf16[2,32,256], index: 0, kind: input, shape index: {}]   ;;  %s1084_s1 = inlined_call_operand.vmem [shape: bf16[8,32], index: 1, kind: input, shape index: {}]   ;;  %s1085_s2 = inlined_call_operand.vmem [shape: f32[8,1], index: 2, kind: input, shape index: {}]   ;;  %s1086_s3 = inlined_call_operand.vmem [shape: bf16[8,72], index: 3, kind: input, shape index: {}]   ;;  %s1087_s4 = inlined_call_operand.vmem [shape: f32[8,1], index: 4, kind: input, shape index: {}]   ;;  %s1088_s5 = inlined_call_operand.vmem [shape: bf16[32,8], index: 5, kind: input, shape index: {}]   ;;  %s1089_s6 = inlined_call_operand.vmem [shape: f32[32,1], index: 6, kind: input, shape index: {}]   ;;  %s1090_s7 = inlined_call_operand.vmem [shape: f32[72,256], index: 7, kind: input, shape index: {}]   ;;  %s1091_s8 = inlined_call_operand.vmem [shape: bf16[2,32,256], index: 8, kind: output, shape index: {}]  }
   0x1 LB: > { %s763_s28 = sadd.s32 4294967295, %s827_s27   ;;  %p767_p0 = scmp.ge.s32.totalorder %s827_s27, 1  ;;  %s827_s27 = sphi %s883_s27, %s18_s27  }
   0x2   : > { %p262_p1 = scmp.lt.s32.totalorder %s827_s27, 3 }
   0x4   : > { %p263_p2 = pnand %p767_p0, %p262_p1 }
   0x5   : > { %p296_p3 = scmp.lt.s32.totalorder (!%p263_p2), %s763_s28, 1  ;;  %s830_s15 = smov (!%p263_p2), 113  }
   0x6   : > { %266 = sbr.rel (%p263_p2) target bundleno = 795 (0x31b), region = 52  ;;  %s831_s16 = smov (!%p263_p2), 111  }
   0x7   : > { %s832_s17 = smov (!%p263_p2), 112   ;;  %s833_s18 = smov (!%p263_p2), 127  }
   0x8   : > { %s834_s19 = smov (!%p263_p2), 15   ;;  %s835_s20 = smov (!%p263_p2), 1  }
   0x9   : > { %s836_s21 = smov (!%p263_p2), 17   ;;  %s837_s22 = smov (!%p263_p2), 16  }
   0xb   : > { %v313_v0 = vld [vmem:[%s1085_s2] sm:$0xff]  ;;  %v829_v1 = vmov 0   ;;  %s1093_s28 = smov (!%p296_p3, %s763_s28), 1  ;;  %vm366_vm0 = vcmask 261120   ;;  %v317_v22 = vld [vmem:[%s1089_s6 + $0x10] sm:$0xff]  ;;  %v316_v23 = vld [vmem:[%s1089_s6 + $0x8] sm:$0xff]  ;;  %v417_v27 = vlaneseq }
   0xc   : > { %402 = vmatprep.mubr.bf16.mxu0 %v829_v1  ;;  %813 = vset.pattern.permute.xlu0 %v829_v1  ;;  %s790_s9 = sshll.u32 %s1093_s28, 5  ;;  %v307_v10 = vld [vmem:[%s1084_s1] sm:$0xf]  ;;  %v318_v24 = vld [vmem:[%s1089_s6 + $0x18] sm:$0xff]  ;;  %v336_v36 = vld [vmem:[%s1090_s7 + $0x88] sm:$0xff]  ;;  %vm508_vm5 = vcmask 1043456  }
   0xd   : > { %343 = vperm.xlu0 %813, %v313_v0   ;;  %547 = vmatprep.mubr.bf16.mxu1 %v829_v1  ;;  %s300_s12 = scalar_lea.vmem %s1083_s0, %s790_s9  ;;  %v315_v20 = vld [vmem:[%s1089_s6] sm:$0xff]  ;;  %v961_v30 = vand.u32 127, %v417_v27  ;;  %v334_v33 = vld [vmem:[%s1090_s7 + $0x78] sm:$0xff]  ;;  %v332_v39 = vld [vmem:[%s1090_s7 + $0x68] sm:$0xff]  ;;  %vm504_vm10 = vcmask 588800   ;;  %vm590_vm11 = vcmask 64512  }
   0xe   : > { %814 = vset.pattern.permute.xlu1 %v829_v1  ;;  %v906_v2 = vld [vmem:[%s300_s12 + $0x10] sm:$0xff]  ;;  %v908_v3 = vld [vmem:[%s300_s12 + $0x18] sm:$0xff]  ;;  %v910_v4 = vld [vmem:[%s300_s12] sm:$0xff] }
   0xf   : > { %v775_v5 = vcombine.high %v906_v2, %v908_v3  ;;  %v774_v6 = vcombine.low %v906_v2, %v908_v3  ;;  %v916_v7 = vld [vmem:[%s300_s12 + $0x8] sm:$0xff]  ;;  %v314_v21 = vld [vmem:[%s1087_s4] sm:$0xff]  ;;  %vm461_vm1 = vcmp.lt.s32.totalorder %v961_v30, 112  ;;  %vm454_vm2 = vcmp.lt.s32.totalorder %v961_v30, 113  ;;  %v333_v43 = vld [vmem:[%s1090_s7 + $0x70] sm:$0xff] }
  0x10   : > { %v773_v8 = vcombine.high %v910_v4, %v916_v7  ;;  %v772_v9 = vcombine.low %v910_v4, %v916_v7  ;;  %vm468_vm3 = vcmp.lt.s32.totalorder %v961_v30, 111  ;;  %v335_v35 = vld [vmem:[%s1090_s7 + $0x80] sm:$0xff]  ;;  %vm447_vm4 = vcmp.lt.s32.totalorder %v961_v30, 127  ;;  %v330_v48 = vld [vmem:[%s1090_s7 + $0x58] sm:$0xff]  ;;  %v328_v58 = vld [vmem:[%s1090_s7 + $0x48] sm:$0xff] }
  0x11   : > { %382 = vmatprep.subr.bf16.mxu0 %v775_v5  ;;  %v331_v50 = vld [vmem:[%s1090_s7 + $0x60] sm:$0xff]  ;;  %vm433_vm6 = vcmp.lt.s32.totalorder %v961_v30, 15  ;;  %vm440_vm7 = vcmp.lt.s32.totalorder %v961_v30, 1  ;;  %v329_v59 = vld [vmem:[%s1090_s7 + $0x50] sm:$0xff]  ;;  %v326_v5 = vld [vmem:[%s1090_s7 + $0x38] sm:$0xff]  ;;  %vm419_vm8 = vcmp.lt.s32.totalorder %v961_v30, 17 }
  0x12   : > { %383 = vmatpush1.bf16.msra.mxu0 %v774_v6  ;;  %vm426_vm9 = vcmp.lt.s32.totalorder %v961_v30, 16 }
  0x13   : > { %384 = vmatprep.subr.bf16.mxu0 %v773_v8 }
  0x16   : > { %385 = vmatpush1.bf16.msra.mxu0 %v772_v9 }
  0x19   : > { %776 = vmatmul.mubr.msk.bf16.vlgmr.msra.gmra.mxu0 %vm366_vm0, %v307_v10  ;;  %v327_v10 = vld [vmem:[%s1090_s7 + $0x40] sm:$0xff] }
  0x1a   : > { %635 = vmatprep.mubr.bf16.mxu0 %v829_v1 }
  0x88   : > { %v344_v11 = vpop.permute.xlu0 %343 }
  0xd9   : > { %v404_v12 = vpop.f32.mrf.mxu0 }
  0xda   : > { %v405_v13 = vadd.f32 %v404_v12, %v344_v11  ;;  %v324_v12 = vld [vmem:[%s1090_s7 + $0x28] sm:$0xff] }
  0xdb   : > { %v406_v14 = vpop.f32.mrf.mxu0 }
  0xdc   : > { %v926_v15 = vmax.f32 %v405_v13, 0.0  ;;  %v407_v16 = vadd.f32 %v406_v14, %v344_v11 }
  0xdd   : > { %v408_v17 = vpop.f32.mrf.mxu0 }
  0xde   : > { %450 = vrot.lane.b32.xlu1 %v926_v15, %s830_s15  ;;  %464 = vrot.lane.b32.xlu0 %v926_v15, %s831_s16  ;;  %v930_v19 = vmax.f32 %v407_v16, 0.0  ;;  %v325_v17 = vld [vmem:[%s1090_s7 + $0x30] sm:$0xff] }
  0xdf   : > { %v409_v18 = vpop.f32.mrf.mxu0 }
  0xe0   : > { %v480_v9 = vmul.f32 %v930_v19, %v328_v58 }
  0xe2   : > { %457 = vrot.lane.b32.xlu1 %v926_v15, %s832_s17  ;;  %452 = vrot.lane.b32.xlu0 %v930_v19, %s830_s15 }
  0xe6   : > { %443 = vrot.lane.b32.xlu1 %v926_v15, %s833_s18  ;;  %459 = vrot.lane.b32.xlu0 %v930_v19, %s832_s17 }
  0xea   : > { %466 = vrot.lane.b32.xlu1 %v930_v19, %s831_s16  ;;  %445 = vrot.lane.b32.xlu0 %v930_v19, %s833_s18 }
  0xee   : > { %429 = vrot.lane.b32.xlu1 %v926_v15, %s834_s19  ;;  %431 = vrot.lane.b32.xlu0 %v930_v19, %s834_s19 }
  0xf2   : > { %436 = vrot.lane.b32.xlu1 %v926_v15, %s835_s20  ;;  %438 = vrot.lane.b32.xlu0 %v930_v19, %s835_s20  ;;  %s1071_s20 = scalar_lea.vmem %s1091_s8, %s790_s9 }
  0xf6   : > { %413 = vrot.lane.b32.xlu1 %v926_v15, %s836_s21  ;;  %415 = vrot.lane.b32.xlu0 %v930_v19, %s836_s21 }
  0xfa   : > { %422 = vrot.lane.b32.xlu1 %v926_v15, %s837_s22  ;;  %424 = vrot.lane.b32.xlu0 %v930_v19, %s837_s22 }
  0xfe   : > { %562 = vperm.xlu0 %813, %v315_v20   ;;  %501 = vperm.xlu1 %814, %v314_v21   ;;  %v479_v21 = vmul.f32 %v926_v15, %v327_v10 }
 0x102   : > { %572 = vperm.xlu0 %813, %v317_v22   ;;  %567 = vperm.xlu1 %814, %v316_v23   ;;  %v323_v22 = vld [vmem:[%s1090_s7 + $0x20] sm:$0xff] }
 0x106   : > { %577 = vperm.xlu1 %814, %v318_v24  }
 0x150   : > { %v451_v25 = vpop.permute.xlu1 %450  ;;  %v465_v26 = vpop.permute.xlu0 %464 }
 0x154   : > { %v458_v28 = vpop.permute.xlu1 %457  ;;  %v453_v29 = vpop.permute.xlu0 %452 }
 0x155   : > { %v456_v40 = vsel %vm454_vm2, %v453_v29, %v451_v25  ;;  %v455_v51 = vsel %vm454_vm2, %v451_v25, %v453_v29  ;;  %v319_v29 = vld [vmem:[%s1090_s7] sm:$0xff] }
 0x156   : > { %v484_v52 = vmul.f32 %v456_v40, %v332_v39  ;;  %v483_v0 = vmul.f32 %v455_v51, %v331_v50 }
 0x158   : > { %v444_v31 = vpop.permute.xlu1 %443  ;;  %v460_v32 = vpop.permute.xlu0 %459 }
 0x159   : > { %v463_v34 = vsel %vm461_vm1, %v460_v32, %v458_v28  ;;  %v462_v44 = vsel %vm461_vm1, %v458_v28, %v460_v32  ;;  %v320_v32 = vld [vmem:[%s1090_s7 + $0x8] sm:$0xff] }
 0x15a   : > { %v486_v45 = vmul.f32 %v463_v34, %v334_v33  ;;  %v485_v57 = vmul.f32 %v462_v44, %v333_v43 }
 0x15c   : > { %v467_v37 = vpop.permute.xlu1 %466  ;;  %v446_v38 = vpop.permute.xlu0 %445  ;;  %v496_v63 = vpack.c.bf16 %v486_v45, %v484_v52  ;;  %v495_v16 = vpack.c.bf16 %v485_v57, %v483_v0 }
 0x15d   : > { %v469_v41 = vsel %vm468_vm3, %v465_v26, %v467_v37  ;;  %v470_v42 = vsel %vm468_vm3, %v467_v37, %v465_v26  ;;  %v449_v49 = vsel %vm447_vm4, %v446_v38, %v444_v31  ;;  %v448_v60 = vsel %vm447_vm4, %v444_v31, %v446_v38 }
 0x15e   : > { %v487_v46 = vmul.f32 %v469_v41, %v335_v35  ;;  %v488_v47 = vmul.f32 %v470_v42, %v336_v36  ;;  %v482_v61 = vmul.f32 %v449_v49, %v330_v48  ;;  %v481_v11 = vmul.f32 %v448_v60, %v329_v59  ;;  %v321_v35 = vld [vmem:[%s1090_s7 + $0x10] sm:$0xff]  ;;  %v322_v36 = vld [vmem:[%s1090_s7 + $0x18] sm:$0xff]  ;;  %v819_v60 = vld [vmem:[%s1088_s5] sm:$0xff]  }
 0x160   : > { %v430_v53 = vpop.permute.xlu1 %429  ;;  %v432_v54 = vpop.permute.xlu0 %431  ;;  %v498_v55 = vpack.c.bf16 %v488_v47, %v488_v47  ;;  %v497_v56 = vpack.c.bf16 %v487_v46, %v487_v46  ;;  %v494_v20 = vpack.c.bf16 %v482_v61, %v480_v9  ;;  %v493_v28 = vpack.c.bf16 %v481_v11, %v479_v21  ;;  %v308_v47 = vld [vmem:[%s1086_s3] sm:$0xf]  ;;  %v820_v61 = vld [vmem:[%s1088_s5 + $0x8] sm:$0xff]  }
 0x161   : > { %v434_v13 = vsel %vm433_vm6, %v430_v53, %v432_v54  ;;  %v435_v23 = vsel %vm433_vm6, %v432_v54, %v430_v53  ;;  %v658_v11 = vunpack.c.l.bf16 %v916_v7 }
 0x162   : > { %777 = vmatprep.subr.msk.bf16.mxu1 %vm508_vm5, %v498_v55  ;;  %v510_v62 = vsel %vm508_vm5, %v497_v56, 0  ;;  %v476_v24 = vmul.f32 %v434_v13, %v324_v12  ;;  %v475_v31 = vmul.f32 %v435_v23, %v323_v22 }
 0x163   : > { %522 = vmatpush1.bf16.msra.mxu1 %v510_v62  ;;  %v656_v62 = vunpack.c.l.bf16 %v910_v4 }
 0x164   : > { %v437_v6 = vpop.permute.xlu1 %436  ;;  %523 = vmatprep.subr.bf16.mxu1 %v496_v63  ;;  %v439_v8 = vpop.permute.xlu0 %438 }
 0x165   : > { %v441_v14 = vsel %vm440_vm7, %v437_v6, %v439_v8  ;;  %v442_v18 = vsel %vm440_vm7, %v439_v8, %v437_v6  ;;  %v657_v6 = vunpack.c.h.bf16 %v910_v4 }
 0x166   : > { %v478_v19 = vmul.f32 %v441_v14, %v326_v5  ;;  %v477_v27 = vmul.f32 %v442_v18, %v325_v17  ;;  %v660_v18 = vunpack.c.l.bf16 %v906_v2 }
 0x167   : > { %524 = vmatpush1.bf16.msra.mxu1 %v495_v16  ;;  %v659_v16 = vunpack.c.h.bf16 %v916_v7  ;;  %v661_v7 = vunpack.c.h.bf16 %v906_v2 }
 0x168   : > { %v414_v25 = vpop.permute.xlu1 %413  ;;  %525 = vmatprep.subr.bf16.mxu1 %v494_v20  ;;  %v416_v26 = vpop.permute.xlu0 %415  ;;  %v492_v15 = vpack.c.bf16 %v478_v19, %v476_v24  ;;  %v491_v40 = vpack.c.bf16 %v477_v27, %v475_v31 }
 0x169   : > { %v420_v33 = vsel %vm419_vm8, %v414_v25, %v416_v26  ;;  %v421_v34 = vsel %vm419_vm8, %v416_v26, %v414_v25 }
 0x16a   : > { %v471_v41 = vmul.f32 %v421_v34, %v319_v29  ;;  %v472_v42 = vmul.f32 %v420_v33, %v320_v32 }
 0x16b   : > { %526 = vmatpush1.bf16.msra.mxu1 %v493_v28  ;;  %v662_v28 = vunpack.c.l.bf16 %v908_v3 }
 0x16c   : > { %v423_v37 = vpop.permute.xlu1 %422  ;;  %v425_v38 = vpop.permute.xlu0 %424  ;;  %527 = vmatprep.subr.bf16.mxu1 %v492_v15 }
 0x16d   : > { %v427_v30 = vsel %vm426_vm9, %v423_v37, %v425_v38  ;;  %v428_v39 = vsel %vm426_vm9, %v425_v38, %v423_v37  ;;  %v663_v38 = vunpack.c.h.bf16 %v908_v3 }
 0x16e   : > { %v473_v43 = vmul.f32 %v428_v39, %v321_v35  ;;  %v474_v44 = vmul.f32 %v427_v30, %v322_v36 }
 0x16f   : > { %528 = vmatpush1.bf16.msra.mxu1 %v491_v40 }
 0x170   : > { %v490_v45 = vpack.c.bf16 %v474_v44, %v472_v42  ;;  %v489_v46 = vpack.c.bf16 %v473_v43, %v471_v41 }
 0x172   : > { %529 = vmatprep.subr.bf16.mxu1 %v490_v45 }
 0x173   : > { %530 = vmatpush1.bf16.msra.mxu1 %v489_v46 }
 0x176   : > { %778 = vmatmul.mubr.msk.bf16.vlgmr.msra.gmra.mxu1 %vm504_vm10, %v308_v47 }
 0x179   : > { %v502_v48 = vpop.permute.xlu1 %501  ;;  %v563_v63 = vpop.permute.xlu0 %562 }
 0x17d   : > { %v568_v12 = vpop.permute.xlu1 %567  ;;  %v573_v4 = vpop.permute.xlu0 %572 }
 0x181   : > { %v578_v33 = vpop.permute.xlu1 %577 }
 0x236   : > { %v549_v49 = vpop.f32.mrf.mxu1 }
 0x237   : > { %v550_v50 = vadd.f32 %v549_v49, %v502_v48 }
 0x238   : > { %v551_v51 = vpop.f32.mrf.mxu1 }
 0x239   : > { %v556_v52 = vmax.f32 %v550_v50, 0.0  ;;  %v552_v53 = vadd.f32 %v551_v51, %v502_v48 }
 0x23a   : > { %v553_v54 = vpop.f32.mrf.mxu1 }
 0x23b   : > { %v558_v55 = vpack.c.bf16 %v556_v52, %v556_v52  ;;  %v557_v56 = vmax.f32 %v552_v53, 0.0 }
 0x23c   : > { %v554_v57 = vpop.f32.mrf.mxu1 }
 0x23d   : > { %v559_v58 = vpack.c.bf16 %v557_v56, %v557_v56  ;;  %v598_v59 = vsel %vm508_vm5, %v558_v55, 0 }
 0x23f   : > { %781 = vmatprep.subr.msk.bf16.mxu0 %vm508_vm5, %v559_v58 }
 0x240   : > { %618 = vmatpush1.bf16.msra.mxu0 %v598_v59 }
 0x243   : > { %782 = vmatmul.mubr.msk.bf16.vlgmr.msra.gmra.mxu0 %vm590_vm11, %v819_v60 }
 0x244   : > { %645 = vmatprep.mubr.bf16.mxu0 %v829_v1 }
 0x24b   : > { %783 = vmatmul.mubr.msk.bf16.gmra.mxu0 %vm590_vm11, %v820_v61 }
 0x303   : > { %v637_v0 = vpop.f32.mrf.mxu0 }
 0x304   : > { %v638_v5 = vadd.f32 %v637_v0, %v563_v63 }
 0x305   : > { %v639_v8 = vpop.f32.mrf.mxu0 }
 0x306   : > { %v664_v9 = vadd.f32 %v656_v62, %v638_v5  ;;  %v640_v10 = vadd.f32 %v639_v8, %v563_v63 }
 0x307   : > { %v641_v1 = vpop.f32.mrf.mxu0 }
 0x308   : > { %v665_v13 = vadd.f32 %v657_v6, %v640_v10  ;;  %v642_v14 = vadd.f32 %v641_v1, %v568_v12  ;;  %v672_v19 = vmax.f32 %v664_v9, 0.0 }
 0x309   : > { %v643_v17 = vpop.f32.mrf.mxu0 }
 0x30a   : > { %v673_v20 = vmax.f32 %v665_v13, 0.0  ;;  %v666_v21 = vadd.f32 %v658_v11, %v642_v14  ;;  %v644_v22 = vadd.f32 %v643_v17, %v568_v12 }
 0x30b   : > { %v647_v23 = vpop.f32.mrf.mxu0 }
 0x30c   : > { %v792_v24 = vpack.c.bf16 %v673_v20, %v672_v19  ;;  %v667_v25 = vadd.f32 %v659_v16, %v644_v22  ;;  %v648_v26 = vadd.f32 %v647_v23, %v573_v4  ;;  %v674_v29 = vmax.f32 %v666_v21, 0.0 }
 0x30d   : > { %v649_v27 = vpop.f32.mrf.mxu0 }
 0x30e   : > { %704 = vst [vmem:[%s1071_s20] sm:$0xff] %v792_v24  ;;  %v675_v15 = vmax.f32 %v667_v25, 0.0  ;;  %v668_v31 = vadd.f32 %v660_v18, %v648_v26  ;;  %v650_v32 = vadd.f32 %v649_v27, %v573_v4 }
 0x30f   : > { %v651_v34 = vpop.f32.mrf.mxu0 }
 0x310   : > { %v793_v35 = vpack.c.bf16 %v675_v15, %v674_v29  ;;  %v669_v36 = vadd.f32 %v661_v7, %v650_v32  ;;  %v652_v37 = vadd.f32 %v651_v34, %v578_v33  ;;  %v676_v2 = vmax.f32 %v668_v31, 0.0 }
 0x311   : > { %v653_v30 = vpop.f32.mrf.mxu0 }
 0x312   : > { %705 = vst [vmem:[%s1071_s20 + $0x8] sm:$0xff] %v793_v35  ;;  %v677_v39 = vmax.f32 %v669_v36, 0.0  ;;  %v670_v40 = vadd.f32 %v662_v28, %v652_v37  ;;  %v654_v41 = vadd.f32 %v653_v30, %v578_v33 }
 0x314   : > { %v794_v42 = vpack.c.bf16 %v677_v39, %v676_v2  ;;  %v671_v43 = vadd.f32 %v663_v38, %v654_v41  ;;  %v678_v44 = vmax.f32 %v670_v40, 0.0 }
 0x316   : > { %706 = vst [vmem:[%s1071_s20 + $0x10] sm:$0xff] %v794_v42  ;;  %v679_v45 = vmax.f32 %v671_v43, 0.0 }
 0x318   : > { %v795_v46 = vpack.c.bf16 %v679_v45, %v678_v44 }
 0x31a   : > { %707 = vst [vmem:[%s1071_s20 + $0x18] sm:$0xff] %v795_v46 }
 0x31b PF: > { %s18_s27 = sadd.s32 1, %s827_s27  }
 0x31c   : > { %p15_p4 = scmp.ge.s32.totalorder %s18_s27, 4  }
 0x31e   :  { %17 = sbr.rel (!%p15_p4) target bundleno = 1 (0x1), region = 82 }

</bundles_post_ra>
